<compile_context>
chip_gen: v5e
topology: v5e:2x2
jax: 0.10.0
libtpu: 0.0.40
codegen_flags: <defaults>
</compile_context>

<pallas_src>
import functools
import math

import jax
import jax.numpy as jnp
from jax.experimental import pallas as pl
from jax.experimental.pallas import tpu as pltpu


# Block-size targets (per measured TPU DMA efficiency: ~512 KiB -> ~85% of
# HBM roofline, ~2 MiB plateaus).  Double-buffered in+out at 2 MiB blocks is
# ~8 MiB of VMEM, safely inside the default scoped limit on v5e/v6e/v7x.
_TARGET_BLOCK_BYTES = 2 * 1024 * 1024
_MIN_SPLIT_BLOCK_BYTES = 512 * 1024


def _erf(z):
    # Exact-GELU needs erf; Mosaic has no erf primitive, so use the
    # Numerical Recipes erfc rational approximation (max error ~1.2e-7,
    # i.e. float32 machine precision) built only from exp/abs/where.
    t = 1.0 / (1.0 + 0.5 * jnp.abs(z))
    poly = t * jnp.exp(
        -z * z - 1.26551223
        + t * (1.00002368 + t * (0.37409196 + t * (0.09678418
        + t * (-0.18628806 + t * (0.27886807 + t * (-1.13520398
        + t * (1.48851587 + t * (-0.82215223 + t * 0.17087277))))))))
    )
    return jnp.where(z >= 0.0, 1.0 - poly, poly - 1.0)


def se_kernel(x_ref, w1_ref, w2_ref, o_ref, *, inv_hw):
    """One block of TB batch elements per grid step.

    x_ref : (TB, C, HWp)  input tile (HWp = HW padded to a multiple of 128)
    w1_ref: (C, hidden)   fc1 weight (no bias), stored (in, out)
    w2_ref: (hidden, C)   fc2 weight (no bias), stored (in, out)
    o_ref : (TB, C, HWp)  output tile
    """
    x = x_ref[...]                                             # (TB, C, HWp)

    # ---- squeeze: global average pool over the spatial (lane) axis --------
    # Padded lanes are zero, so dividing by the *true* HW gives the mean.
    y = jnp.sum(x, axis=-1) * inv_hw                           # (TB, C)

    # ---- excite: fc1 -> exact GELU -> fc2 -> sigmoid, batched over TB -----
    h = jnp.dot(y, w1_ref[...], preferred_element_type=jnp.float32)   # (TB, hidden)
    h = 0.5 * h * (1.0 + _erf(h * (1.0 / math.sqrt(2.0))))            # GELU (erf)
    s = jnp.dot(h, w2_ref[...], preferred_element_type=jnp.float32)   # (TB, C)
    s = 1.0 / (1.0 + jnp.exp(-s))                                     # sigmoid

    # ---- scale: broadcast per-(batch, channel) gate over spatial lanes ----
    o_ref[...] = (x * s[:, :, None]).astype(o_ref.dtype)


def _build_se_call(b, c, hw_pad, hidden, tb, inv_hw, dtype, cost_estimate,
                   single_buffer_weights):
    grid = (pl.cdiv(b, tb),)
    w_kwargs = {}
    if single_buffer_weights:
        # Weight blocks never change across grid steps -> no double buffer.
        w_kwargs = dict(pipeline_mode=pl.Buffered(1))
    return pl.pallas_call(
        functools.partial(se_kernel, inv_hw=inv_hw),
        out_shape=jax.ShapeDtypeStruct((b, c, hw_pad), dtype),
        grid=grid,
        in_specs=[
            pl.BlockSpec((tb, c, hw_pad), lambda i: (i, 0, 0)),
            pl.BlockSpec((c, hidden), lambda i: (0, 0), **w_kwargs),
            pl.BlockSpec((hidden, c), lambda i: (0, 0), **w_kwargs),
        ],
        out_specs=pl.BlockSpec((tb, c, hw_pad), lambda i: (i, 0, 0)),
        compiler_params=pltpu.CompilerParams(
            dimension_semantics=("parallel",)),
        cost_estimate=cost_estimate,
    )


def se_forward(x, w1, w2):
    """x: (B, C, H, W) NCHW float32; w1: (C, hidden); w2: (hidden, C)."""
    b, c, hh, ww = x.shape
    hw = hh * ww
    hidden = w1.shape[1]

    # Lane-dense spatial axis: pad HW up to a multiple of 128 so stores are
    # full-width (unmasked) vst even for 14x14 / 7x7 SE stages.
    hw_pad = ((hw + 127) // 128) * 128
    x3 = x.reshape(b, c, hw)
    if hw_pad != hw:
        x3 = jnp.pad(x3, ((0, 0), (0, 0), (0, hw_pad - hw)))

    # Choose how many batch elements per grid step: aim for ~2 MiB blocks
    # (HBM-bound op; big DMAs amortize the ~0.35 us per-step overhead), but
    # keep at least 2 grid steps for megacore sharding when that still leaves
    # reasonably sized blocks.
    per_elem_bytes = c * hw_pad * x.dtype.itemsize
    tb = max(1, min(b, _TARGET_BLOCK_BYTES // per_elem_bytes))
    if tb == b and b > 1 and pl.cdiv(b, 2) * per_elem_bytes >= _MIN_SPLIT_BLOCK_BYTES:
        tb = pl.cdiv(b, 2)

    inv_hw = 1.0 / float(hw)
    cost = pl.CostEstimate(
        flops=2 * b * c * hw + 4 * b * c * hidden,      # pool + scale + 2 GEMMs
        transcendentals=b * (hidden + c),               # gelu-erf exp + sigmoid exp
        bytes_accessed=2 * b * c * hw * x.dtype.itemsize
        + 2 * c * hidden * w1.dtype.itemsize,
    )

    try:
        call = _build_se_call(b, c, hw_pad, hidden, tb, inv_hw, x.dtype, cost,
                              single_buffer_weights=True)
        out = jax.block_until_ready(call(x3, w1, w2))
    except Exception:
        # Fallback: identical kernel, default (double-buffered) weight specs.
        call = _build_se_call(b, c, hw_pad, hidden, tb, inv_hw, x.dtype, cost,
                              single_buffer_weights=False)
        out = call(x3, w1, w2)

    if hw_pad != hw:
        out = out[..., :hw]
    return out.reshape(b, c, hh, ww)


def se_reference(x, w1, w2):
    # Pure-JAX reference mirroring the PyTorch forward.
    y = jnp.mean(x, axis=(2, 3))                      # (B, C)
    y = jax.nn.gelu(y @ w1, approximate=False)        # exact GELU
    y = jax.nn.sigmoid(y @ w2)                        # (B, C)
    return x * y[:, :, None, None]


if __name__ == "__main__":
    # SE(inp=8, oup=8, expansion=0.25) -> hidden = int(8 * 0.25) = 2
    B, C, H, W = 2, 8, 16, 16
    HIDDEN = int(C * 0.25)

    key = jax.random.PRNGKey(0)
    kx, k1, k2 = jax.random.split(key, 3)
    x = jax.random.normal(kx, (B, C, H, W), dtype=jnp.float32)
    # Deterministic synthetic weights, stored (in, out).
    w1 = jax.random.normal(k1, (C, HIDDEN), dtype=jnp.float32) * 0.1
    w2 = jax.random.normal(k2, (HIDDEN, C), dtype=jnp.float32) * 0.1

    out = jax.block_until_ready(se_forward(x, w1, w2))
    ref = jax.block_until_ready(se_reference(x, w1, w2))

    assert out.shape == (B, C, H, W)
    assert jnp.allclose(out, ref, atol=1e-5, rtol=1e-5), "mismatch vs reference"
    print("KERNEL_OK")
</pallas_src>

<mosaic_0001>
module attributes {stable_mosaic.version = 11 : i64} {
  func.func @se_kernel(%arg0: i32, %arg1: memref<2x8x256xf32, #tpu.memory_space<vmem>>, %arg2: memref<8x2xf32, #tpu.memory_space<vmem>>, %arg3: memref<2x8xf32, #tpu.memory_space<vmem>>, %arg4: memref<2x8x256xf32, #tpu.memory_space<vmem>>) attributes {dimension_semantics = [#tpu.dimension_semantics<parallel>], iteration_bounds = array<i64: 1>, scalar_prefetch = 0 : i64, scratch_operands = 0 : i64, tpu.core_type = #tpu.core_type<tc>, window_params = [{transform_indices = @transform_0, window_bounds = array<i64: 2, 8, 256>}, {pipeline_mode = #tpu.pipeline_mode<synchronous>, transform_indices = @transform_1, window_bounds = array<i64: 8, 2>}, {pipeline_mode = #tpu.pipeline_mode<synchronous>, transform_indices = @transform_2, window_bounds = array<i64: 2, 8>}, {transform_indices = @transform_3, window_bounds = array<i64: 2, 8, 256>}]} {
    %c0 = arith.constant 0 : index
    %c0_0 = arith.constant 0 : index
    %c0_1 = arith.constant 0 : index
    %0 = vector.load %arg1[%c0, %c0_0, %c0_1] : memref<2x8x256xf32, #tpu.memory_space<vmem>>, vector<2x8x256xf32>
    %cst = arith.constant dense<0.000000e+00> : vector<2x8xf32>
    %1 = vector.multi_reduction <add>, %0, %cst [2] : vector<2x8x256xf32> to vector<2x8xf32>
    %cst_2 = arith.constant 3.906250e-03 : f32
    %2 = vector.broadcast %cst_2 : f32 to vector<2x8xf32>
    %3 = arith.mulf %1, %2 : vector<2x8xf32>
    %c0_3 = arith.constant 0 : index
    %c0_4 = arith.constant 0 : index
    %4 = vector.load %arg2[%c0_3, %c0_4] : memref<8x2xf32, #tpu.memory_space<vmem>>, vector<8x2xf32>
    %cst_5 = arith.constant dense<0.000000e+00> : vector<2x2xf32>
    %5 = tpu.matmul %3, %4, %cst_5 {dimension_numbers = #tpu.dot_dimension_numbers<[1], [0], [0], [1], [0, 0, 1, 1], [], []>} : vector<2x8xf32>, vector<8x2xf32>, vector<2x2xf32> -> vector<2x2xf32>
    %cst_6 = arith.constant 5.000000e-01 : f32
    %6 = vector.broadcast %cst_6 : f32 to vector<2x2xf32>
    %7 = arith.mulf %6, %5 : vector<2x2xf32>
    %cst_7 = arith.constant 0.707106769 : f32
    %8 = vector.broadcast %cst_7 : f32 to vector<2x2xf32>
    %9 = arith.mulf %5, %8 : vector<2x2xf32>
    %10 = math.absf %9 : vector<2x2xf32>
    %cst_8 = arith.constant 5.000000e-01 : f32
    %11 = vector.broadcast %cst_8 : f32 to vector<2x2xf32>
    %12 = arith.mulf %11, %10 : vector<2x2xf32>
    %cst_9 = arith.constant 1.000000e+00 : f32
    %13 = vector.broadcast %cst_9 : f32 to vector<2x2xf32>
    %14 = arith.addf %13, %12 : vector<2x2xf32>
    %cst_10 = arith.constant 1.000000e+00 : f32
    %15 = vector.broadcast %cst_10 : f32 to vector<2x2xf32>
    %16 = arith.divf %15, %14 : vector<2x2xf32>
    %cst_11 = arith.constant 0.000000e+00 : f32
    %17 = vector.broadcast %cst_11 : f32 to vector<2x2xf32>
    %18 = arith.subf %17, %9 : vector<2x2xf32>
    %19 = arith.mulf %18, %9 : vector<2x2xf32>
    %cst_12 = arith.constant 1.26551223 : f32
    %20 = vector.broadcast %cst_12 : f32 to vector<2x2xf32>
    %21 = arith.subf %19, %20 : vector<2x2xf32>
    %cst_13 = arith.constant 0.170872763 : f32
    %22 = vector.broadcast %cst_13 : f32 to vector<2x2xf32>
    %23 = arith.mulf %16, %22 : vector<2x2xf32>
    %cst_14 = arith.constant -0.822152256 : f32
    %24 = vector.broadcast %cst_14 : f32 to vector<2x2xf32>
    %25 = arith.addf %24, %23 : vector<2x2xf32>
    %26 = arith.mulf %16, %25 : vector<2x2xf32>
    %cst_15 = arith.constant 1.48851585 : f32
    %27 = vector.broadcast %cst_15 : f32 to vector<2x2xf32>
    %28 = arith.addf %27, %26 : vector<2x2xf32>
    %29 = arith.mulf %16, %28 : vector<2x2xf32>
    %cst_16 = arith.constant -1.13520396 : f32
    %30 = vector.broadcast %cst_16 : f32 to vector<2x2xf32>
    %31 = arith.addf %30, %29 : vector<2x2xf32>
    %32 = arith.mulf %16, %31 : vector<2x2xf32>
    %cst_17 = arith.constant 0.278868079 : f32
    %33 = vector.broadcast %cst_17 : f32 to vector<2x2xf32>
    %34 = arith.addf %33, %32 : vector<2x2xf32>
    %35 = arith.mulf %16, %34 : vector<2x2xf32>
    %cst_18 = arith.constant -0.186288059 : f32
    %36 = vector.broadcast %cst_18 : f32 to vector<2x2xf32>
    %37 = arith.addf %36, %35 : vector<2x2xf32>
    %38 = arith.mulf %16, %37 : vector<2x2xf32>
    %cst_19 = arith.constant 0.0967841818 : f32
    %39 = vector.broadcast %cst_19 : f32 to vector<2x2xf32>
    %40 = arith.addf %39, %38 : vector<2x2xf32>
    %41 = arith.mulf %16, %40 : vector<2x2xf32>
    %cst_20 = arith.constant 0.374091953 : f32
    %42 = vector.broadcast %cst_20 : f32 to vector<2x2xf32>
    %43 = arith.addf %42, %41 : vector<2x2xf32>
    %44 = arith.mulf %16, %43 : vector<2x2xf32>
    %cst_21 = arith.constant 1.00002372 : f32
    %45 = vector.broadcast %cst_21 : f32 to vector<2x2xf32>
    %46 = arith.addf %45, %44 : vector<2x2xf32>
    %47 = arith.mulf %16, %46 : vector<2x2xf32>
    %48 = arith.addf %21, %47 : vector<2x2xf32>
    %49 = math.exp %48 : vector<2x2xf32>
    %50 = arith.mulf %16, %49 : vector<2x2xf32>
    %cst_22 = arith.constant 0.000000e+00 : f32
    %51 = vector.broadcast %cst_22 : f32 to vector<2x2xf32>
    %52 = arith.cmpf oge, %9, %51 : vector<2x2xf32>
    %cst_23 = arith.constant 1.000000e+00 : f32
    %53 = vector.broadcast %cst_23 : f32 to vector<2x2xf32>
    %54 = arith.subf %53, %50 : vector<2x2xf32>
    %cst_24 = arith.constant 1.000000e+00 : f32
    %55 = vector.broadcast %cst_24 : f32 to vector<2x2xf32>
    %56 = arith.subf %50, %55 : vector<2x2xf32>
    %57 = arith.select %52, %54, %56 : vector<2x2xi1>, vector<2x2xf32>
    %cst_25 = arith.constant 1.000000e+00 : f32
    %58 = vector.broadcast %cst_25 : f32 to vector<2x2xf32>
    %59 = arith.addf %58, %57 : vector<2x2xf32>
    %60 = arith.mulf %7, %59 : vector<2x2xf32>
    %c0_26 = arith.constant 0 : index
    %c0_27 = arith.constant 0 : index
    %61 = vector.load %arg3[%c0_26, %c0_27] : memref<2x8xf32, #tpu.memory_space<vmem>>, vector<2x8xf32>
    %cst_28 = arith.constant dense<0.000000e+00> : vector<2x8xf32>
    %62 = tpu.matmul %60, %61, %cst_28 {dimension_numbers = #tpu.dot_dimension_numbers<[1], [0], [0], [1], [0, 0, 1, 1], [], []>} : vector<2x2xf32>, vector<2x8xf32>, vector<2x8xf32> -> vector<2x8xf32>
    %cst_29 = arith.constant 0.000000e+00 : f32
    %63 = vector.broadcast %cst_29 : f32 to vector<2x8xf32>
    %64 = arith.subf %63, %62 : vector<2x8xf32>
    %65 = math.exp %64 : vector<2x8xf32>
    %cst_30 = arith.constant 1.000000e+00 : f32
    %66 = vector.broadcast %cst_30 : f32 to vector<2x8xf32>
    %67 = arith.addf %66, %65 : vector<2x8xf32>
    %cst_31 = arith.constant 1.000000e+00 : f32
    %68 = vector.broadcast %cst_31 : f32 to vector<2x8xf32>
    %69 = arith.divf %68, %67 : vector<2x8xf32>
    %70 = vector.shape_cast %69 : vector<2x8xf32> to vector<2x8x1xf32>
    %71 = vector.broadcast %70 : vector<2x8x1xf32> to vector<2x8x256xf32>
    %72 = arith.mulf %0, %71 : vector<2x8x256xf32>
    %c0_32 = arith.constant 0 : index
    %c0_33 = arith.constant 0 : index
    %c0_34 = arith.constant 0 : index
    %73 = vector.load %arg4[%c0_32, %c0_33, %c0_34] : memref<2x8x256xf32, #tpu.memory_space<vmem>>, vector<2x8x256xf32>
    tpu.vector_store %arg4[%c0_32, %c0_33, %c0_34], %72 {strides = array<i32>} : memref<2x8x256xf32, #tpu.memory_space<vmem>>, vector<2x8x256xf32>,
    return
  }
  func.func @transform_0(%arg0: i32) -> (i32, i32, i32) {
    %c0_i32 = arith.constant 0 : i32
    %c0_i32_0 = arith.constant 0 : i32
    %c0_i32_1 = arith.constant 0 : i32
    return %arg0, %c0_i32, %c0_i32_0 : i32, i32, i32
  }
  func.func @transform_1(%arg0: i32) -> (i32, i32) {
    %c0_i32 = arith.constant 0 : i32
    %c0_i32_0 = arith.constant 0 : i32
    %c0_i32_1 = arith.constant 0 : i32
    return %c0_i32, %c0_i32_0 : i32, i32
  }
  func.func @transform_2(%arg0: i32) -> (i32, i32) {
    %c0_i32 = arith.constant 0 : i32
    %c0_i32_0 = arith.constant 0 : i32
    %c0_i32_1 = arith.constant 0 : i32
    return %c0_i32, %c0_i32_0 : i32, i32
  }
  func.func @transform_3(%arg0: i32) -> (i32, i32, i32) {
    %c0_i32 = arith.constant 0 : i32
    %c0_i32_0 = arith.constant 0 : i32
    %c0_i32_1 = arith.constant 0 : i32
    return %arg0, %c0_i32, %c0_i32_0 : i32, i32, i32
  }
}

module attributes {stable_mosaic.version = 11 : i64} {
  func.func @se_kernel(%arg0: i32, %arg1: memref<2x8x256xf32, #tpu.memory_space<vmem>>, %arg2: memref<8x2xf32, #tpu.memory_space<vmem>>, %arg3: memref<2x8xf32, #tpu.memory_space<vmem>>, %arg4: memref<2x8x256xf32, #tpu.memory_space<vmem>>) attributes {dimension_semantics = [#tpu.dimension_semantics<parallel>], iteration_bounds = array<i64: 1>, scalar_prefetch = 0 : i64, scratch_operands = 0 : i64, tpu.core_type = #tpu.core_type<tc>, window_params = [{transform_indices = @transform_0, window_bounds = array<i64: 2, 8, 256>}, {pipeline_mode = #tpu.pipeline_mode<synchronous>, transform_indices = @transform_1, window_bounds = array<i64: 8, 2>}, {pipeline_mode = #tpu.pipeline_mode<synchronous>, transform_indices = @transform_2, window_bounds = array<i64: 2, 8>}, {transform_indices = @transform_3, window_bounds = array<i64: 2, 8, 256>}]} {
    %c0 = arith.constant 0 : index
    %c0_0 = arith.constant 0 : index
    %c0_1 = arith.constant 0 : index
    %0 = vector.load %arg1[%c0, %c0_0, %c0_1] : memref<2x8x256xf32, #tpu.memory_space<vmem>>, vector<2x8x256xf32>
    %cst = arith.constant dense<0.000000e+00> : vector<2x8xf32>
    %1 = vector.multi_reduction <add>, %0, %cst [2] : vector<2x8x256xf32> to vector<2x8xf32>
    %cst_2 = arith.constant 3.906250e-03 : f32
    %2 = vector.broadcast %cst_2 : f32 to vector<2x8xf32>
    %3 = arith.mulf %1, %2 : vector<2x8xf32>
    %c0_3 = arith.constant 0 : index
    %c0_4 = arith.constant 0 : index
    %4 = vector.load %arg2[%c0_3, %c0_4] : memref<8x2xf32, #tpu.memory_space<vmem>>, vector<8x2xf32>
    %cst_5 = arith.constant dense<0.000000e+00> : vector<2x2xf32>
    %5 = tpu.matmul %3, %4, %cst_5 {dimension_numbers = #tpu.dot_dimension_numbers<[1], [0], [0], [1], [0, 0, 1, 1], [], []>} : vector<2x8xf32>, vector<8x2xf32>, vector<2x2xf32> -> vector<2x2xf32>
    %cst_6 = arith.constant 5.000000e-01 : f32
    %6 = vector.broadcast %cst_6 : f32 to vector<2x2xf32>
    %7 = arith.mulf %6, %5 : vector<2x2xf32>
    %cst_7 = arith.constant 0.707106769 : f32
    %8 = vector.broadcast %cst_7 : f32 to vector<2x2xf32>
    %9 = arith.mulf %5, %8 : vector<2x2xf32>
    %10 = math.absf %9 : vector<2x2xf32>
    %cst_8 = arith.constant 5.000000e-01 : f32
    %11 = vector.broadcast %cst_8 : f32 to vector<2x2xf32>
    %12 = arith.mulf %11, %10 : vector<2x2xf32>
    %cst_9 = arith.constant 1.000000e+00 : f32
    %13 = vector.broadcast %cst_9 : f32 to vector<2x2xf32>
    %14 = arith.addf %13, %12 : vector<2x2xf32>
    %cst_10 = arith.constant 1.000000e+00 : f32
    %15 = vector.broadcast %cst_10 : f32 to vector<2x2xf32>
    %16 = arith.divf %15, %14 : vector<2x2xf32>
    %cst_11 = arith.constant 0.000000e+00 : f32
    %17 = vector.broadcast %cst_11 : f32 to vector<2x2xf32>
    %18 = arith.subf %17, %9 : vector<2x2xf32>
    %19 = arith.mulf %18, %9 : vector<2x2xf32>
    %cst_12 = arith.constant 1.26551223 : f32
    %20 = vector.broadcast %cst_12 : f32 to vector<2x2xf32>
    %21 = arith.subf %19, %20 : vector<2x2xf32>
    %cst_13 = arith.constant 0.170872763 : f32
    %22 = vector.broadcast %cst_13 : f32 to vector<2x2xf32>
    %23 = arith.mulf %16, %22 : vector<2x2xf32>
    %cst_14 = arith.constant -0.822152256 : f32
    %24 = vector.broadcast %cst_14 : f32 to vector<2x2xf32>
    %25 = arith.addf %24, %23 : vector<2x2xf32>
    %26 = arith.mulf %16, %25 : vector<2x2xf32>
    %cst_15 = arith.constant 1.48851585 : f32
    %27 = vector.broadcast %cst_15 : f32 to vector<2x2xf32>
    %28 = arith.addf %27, %26 : vector<2x2xf32>
    %29 = arith.mulf %16, %28 : vector<2x2xf32>
    %cst_16 = arith.constant -1.13520396 : f32
    %30 = vector.broadcast %cst_16 : f32 to vector<2x2xf32>
    %31 = arith.addf %30, %29 : vector<2x2xf32>
    %32 = arith.mulf %16, %31 : vector<2x2xf32>
    %cst_17 = arith.constant 0.278868079 : f32
    %33 = vector.broadcast %cst_17 : f32 to vector<2x2xf32>
    %34 = arith.addf %33, %32 : vector<2x2xf32>
    %35 = arith.mulf %16, %34 : vector<2x2xf32>
    %cst_18 = arith.constant -0.186288059 : f32
    %36 = vector.broadcast %cst_18 : f32 to vector<2x2xf32>
    %37 = arith.addf %36, %35 : vector<2x2xf32>
    %38 = arith.mulf %16, %37 : vector<2x2xf32>
    %cst_19 = arith.constant 0.0967841818 : f32
    %39 = vector.broadcast %cst_19 : f32 to vector<2x2xf32>
    %40 = arith.addf %39, %38 : vector<2x2xf32>
    %41 = arith.mulf %16, %40 : vector<2x2xf32>
    %cst_20 = arith.constant 0.374091953 : f32
    %42 = vector.broadcast %cst_20 : f32 to vector<2x2xf32>
    %43 = arith.addf %42, %41 : vector<2x2xf32>
    %44 = arith.mulf %16, %43 : vector<2x2xf32>
    %cst_21 = arith.constant 1.00002372 : f32
    %45 = vector.broadcast %cst_21 : f32 to vector<2x2xf32>
    %46 = arith.addf %45, %44 : vector<2x2xf32>
    %47 = arith.mulf %16, %46 : vector<2x2xf32>
    %48 = arith.addf %21, %47 : vector<2x2xf32>
    %49 = math.exp %48 : vector<2x2xf32>
    %50 = arith.mulf %16, %49 : vector<2x2xf32>
    %cst_22 = arith.constant 0.000000e+00 : f32
    %51 = vector.broadcast %cst_22 : f32 to vector<2x2xf32>
    %52 = arith.cmpf oge, %9, %51 : vector<2x2xf32>
    %cst_23 = arith.constant 1.000000e+00 : f32
    %53 = vector.broadcast %cst_23 : f32 to vector<2x2xf32>
    %54 = arith.subf %53, %50 : vector<2x2xf32>
    %cst_24 = arith.constant 1.000000e+00 : f32
    %55 = vector.broadcast %cst_24 : f32 to vector<2x2xf32>
    %56 = arith.subf %50, %55 : vector<2x2xf32>
    %57 = arith.select %52, %54, %56 : vector<2x2xi1>, vector<2x2xf32>
    %cst_25 = arith.constant 1.000000e+00 : f32
    %58 = vector.broadcast %cst_25 : f32 to vector<2x2xf32>
    %59 = arith.addf %58, %57 : vector<2x2xf32>
    %60 = arith.mulf %7, %59 : vector<2x2xf32>
    %c0_26 = arith.constant 0 : index
    %c0_27 = arith.constant 0 : index
    %61 = vector.load %arg3[%c0_26, %c0_27] : memref<2x8xf32, #tpu.memory_space<vmem>>, vector<2x8xf32>
    %cst_28 = arith.constant dense<0.000000e+00> : vector<2x8xf32>
    %62 = tpu.matmul %60, %61, %cst_28 {dimension_numbers = #tpu.dot_dimension_numbers<[1], [0], [0], [1], [0, 0, 1, 1], [], []>} : vector<2x2xf32>, vector<2x8xf32>, vector<2x8xf32> -> vector<2x8xf32>
    %cst_29 = arith.constant 0.000000e+00 : f32
    %63 = vector.broadcast %cst_29 : f32 to vector<2x8xf32>
    %64 = arith.subf %63, %62 : vector<2x8xf32>
    %65 = math.exp %64 : vector<2x8xf32>
    %cst_30 = arith.constant 1.000000e+00 : f32
    %66 = vector.broadcast %cst_30 : f32 to vector<2x8xf32>
    %67 = arith.addf %66, %65 : vector<2x8xf32>
    %cst_31 = arith.constant 1.000000e+00 : f32
    %68 = vector.broadcast %cst_31 : f32 to vector<2x8xf32>
    %69 = arith.divf %68, %67 : vector<2x8xf32>
    %70 = vector.shape_cast %69 : vector<2x8xf32> to vector<2x8x1xf32>
    %71 = vector.broadcast %70 : vector<2x8x1xf32> to vector<2x8x256xf32>
    %72 = arith.mulf %0, %71 : vector<2x8x256xf32>
    %c0_32 = arith.constant 0 : index
    %c0_33 = arith.constant 0 : index
    %c0_34 = arith.constant 0 : index
    %73 = vector.load %arg4[%c0_32, %c0_33, %c0_34] : memref<2x8x256xf32, #tpu.memory_space<vmem>>, vector<2x8x256xf32>
    tpu.vector_store %arg4[%c0_32, %c0_33, %c0_34], %72 {strides = array<i32>} : memref<2x8x256xf32, #tpu.memory_space<vmem>>, vector<2x8x256xf32>,
    return
  }
  func.func @transform_0(%arg0: i32) -> (i32, i32, i32) {
    %c0_i32 = arith.constant 0 : i32
    %c0_i32_0 = arith.constant 0 : i32
    %c0_i32_1 = arith.constant 0 : i32
    return %arg0, %c0_i32, %c0_i32_0 : i32, i32, i32
  }
  func.func @transform_1(%arg0: i32) -> (i32, i32) {
    %c0_i32 = arith.constant 0 : i32
    %c0_i32_0 = arith.constant 0 : i32
    %c0_i32_1 = arith.constant 0 : i32
    return %c0_i32, %c0_i32_0 : i32, i32
  }
  func.func @transform_2(%arg0: i32) -> (i32, i32) {
    %c0_i32 = arith.constant 0 : i32
    %c0_i32_0 = arith.constant 0 : i32
    %c0_i32_1 = arith.constant 0 : i32
    return %c0_i32, %c0_i32_0 : i32, i32
  }
  func.func @transform_3(%arg0: i32) -> (i32, i32, i32) {
    %c0_i32 = arith.constant 0 : i32
    %c0_i32_0 = arith.constant 0 : i32
    %c0_i32_1 = arith.constant 0 : i32
    return %arg0, %c0_i32, %c0_i32_0 : i32, i32, i32
  }
}

</mosaic_0001>

<bundles_post_ra>
// kernel: tpu_custom_call.1
= control target key start
LH: loop header
LB: loop body
LE: loop exit
PB: predicated region body
PF: predicated region fallthrough
CT: control target
= control target key end

     0   :  { %8 = vsyncpa [#allocation3], 0  ;;  %s345_s0 = inlined_call_operand.hbm [shape: f32[2,8,256], index: 0, kind: input, shape index: {}]   ;;  %s346_s1 = inlined_call_operand.vmem [shape: f32[8,2], index: 1, kind: input, shape index: {}]   ;;  %s347_s2 = inlined_call_operand.vmem [shape: f32[2,8], index: 2, kind: input, shape index: {}]   ;;  %s348_s3 = inlined_call_operand.hbm [shape: f32[2,8,256], index: 3, kind: output, shape index: {}]  }
   0x1   :  { %9 = vsyncpa [#allocation4], 0  ;;  %s14_s14 = sshll.u32 %s345_s0, 4  ;;  %s285_s15 = smov [#allocation2]   ;;  %s15_s14 = int_to_ptr.hbm [resolvable:$true] %s14_s14 }
   0x2   :  { %s16_s16 = sshll.u32 %s285_s15, 4  ;;  %s286_s17 = smov 256   ;;  %s17_s16 = int_to_ptr.vmem [resolvable:$true] %s16_s16 }
   0x3   :  { %s287_s18 = smov 16  }
   0x4   :  { %22 = dma.hbm_to_vmem [thread:$0]  %s15_s14, 512, %s17_s16, [#allocation3], %s286_s17, %s286_s17, %s287_s18  }
   0x5   :  { %281 = dma.done.wait [#allocation3], 512  }
   0x6   :  { %282 = vsyncadd [#allocation3], 4294966784  ;;  %v315_v0 = vld [vmem:[#allocation2] sm:$0xff]  ;;  %v317_v1 = vld [vmem:[#allocation2 + $0x8] sm:$0xff]  ;;  %v46_v8 = vlaneseq  ;;  %vm50_vm0 = vcmask 1041409   ;;  %vm52_vm1 = vcmask 64512  }
   0x7   :  { %v35_v2 = vadd.f32 %v317_v1, %v315_v0  ;;  %v321_v3 = vld [vmem:[#allocation2 + $0x10] sm:$0xff]  ;;  %v323_v4 = vld [vmem:[#allocation2 + $0x18] sm:$0xff]  ;;  %v43_v6 = vld [vmem:[%s346_s1] sm:$0xff]  ;;  %vm130_vm6 = vcmask 1041408   ;;  %vm126_vm8 = vcmask 15360   ;;  %s201_s24 = sshll.u32 %s348_s3, 4  ;;  %s202_s24 = int_to_ptr.hbm [resolvable:$true] %s201_s24 }
   0x8   :  { %v38_v5 = vadd.f32 %v323_v4, %v321_v3  ;;  %70 = vmatpush.msra.mxu0 %v43_v6  ;;  %v47_v9 = vand.u32 127, %v46_v8  ;;  %v125_v42 = vld [vmem:[%s347_s2] sm:$0x3]  ;;  %v175_v62 = vshrl.u32 %v46_v8, 7  ;;  %s288_s2 = smov [#allocation5]  }
   0x9   :  { %36 = vadd.xlane.f32.xlu0 %v35_v2  ;;  %217 = vmatpush.msk.msra.mxu1 %vm130_vm6, %v125_v42  ;;  %s199_s21 = sshll.u32 %s288_s2, 4  ;;  %s200_s21 = int_to_ptr.vmem [resolvable:$true] %s199_s21 }
   0xa   :  { %223 = vset.pattern.permute.xlu1 %v175_v62  ;;  %224 = vset.pattern.permute.xlu0 %v175_v62 }
  0x11   :  { %39 = vadd.xlane.f32.xlu0 %v38_v5 }
  0x7c   :  { %v37_v7 = vpop.xlane.xlu0 %36 }
  0x7d   :  { %v41_v10 = vmul.f32 0.00390625, %v37_v7 }
  0x7f   :  { %v48_v13 = vperm.slane %v41_v10, %v47_v9 }
  0x84   :  { %v40_v11 = vpop.xlane.xlu0 %39 }
  0x85   :  { %v42_v12 = vmul.f32 0.00390625, %v40_v11 }
  0x87   :  { %v49_v14 = vperm.slane %v42_v12, %v47_v9 }
  0x89   :  { %v51_v15 = vsel %vm50_vm0, %v49_v14, %v48_v13 }
  0x8a   :  { %214 = vmatmul.msk.f32.vlgmr.msra.gmra.mxu0 %vm52_vm1, %v51_v15 }
 0x107   :  { %v72_v16 = vpop.f32.mrf.mxu0 }
 0x108   :  { %v76_v17 = vmul.f32 0.70710677, %v72_v16  ;;  %v75_v59 = vmul.f32 0.5, %v72_v16 }
 0x10a   :  { %v77_v18 = vand.u32 2147483647, %v76_v17  ;;  %v95_v44 = vsub.f32 0.0, %v76_v17  ;;  %vm119_vm7 = vcmp.ge.f32.partialorder %v76_v17, 0.0 }
 0x10c   :  { %v78_v19 = vmul.f32 0.5, %v77_v18  ;;  %v96_v47 = vmul.f32 %v95_v44, %v76_v17 }
 0x10e   :  { %v79_v20 = vadd.f32 1.0, %v78_v19  ;;  %v215_v50 = vadd.f32 -1.2655122, %v96_v47 }
 0x110   :  { %225 = vrcp.f32 %v79_v20  ;;  %v91_v24 = vand.u32 2147483648, %v79_v20  ;;  %v89_v26 = vand.u32 2147483647, %v79_v20  ;;  %vm85_vm3 = vweird.f32 %v79_v20 }
 0x112   :  { %v92_v28 = vor.u32 1.1754944e-38, %v91_v24  ;;  %vm90_vm5 = vcmp.eq.f32.partialorder %v89_v26, 8.507059e+37 }
 0x116   :  { %v226_v21 = vpop.eup %225 }
 0x117   :  { %v81_v22 = vmul.f32 %v226_v21, %v79_v20  ;;  %vm86_vm2 = vweird.f32 %v226_v21 }
 0x118   :  { %vm87_vm4 = vmor %vm85_vm3, %vm86_vm2 }
 0x119   :  { %v82_v23 = vsub.f32 1.0, %v81_v22 }
 0x11b   :  { %v83_v25 = vmul.f32 %v226_v21, %v82_v23 }
 0x11d   :  { %v84_v27 = vadd.f32 %v226_v21, %v83_v25 }
 0x11f   :  { %v88_v29 = vsel %vm87_vm4, %v226_v21, %v84_v27 }
 0x120   :  { %v93_v30 = vsel %vm90_vm5, %v92_v28, %v88_v29 }
 0x121   :  { %v98_v31 = vmul.f32 0.17087276, %v93_v30 }
 0x123   :  { %v99_v32 = vadd.f32 -0.82215226, %v98_v31 }
 0x125   :  { %v100_v33 = vmul.f32 %v99_v32, %v93_v30 }
 0x127   :  { %v101_v34 = vadd.f32 1.4885159, %v100_v33 }
 0x129   :  { %v102_v35 = vmul.f32 %v101_v34, %v93_v30 }
 0x12b   :  { %v103_v36 = vadd.f32 -1.135204, %v102_v35 }
 0x12d   :  { %v104_v37 = vmul.f32 %v103_v36, %v93_v30 }
 0x12f   :  { %v105_v38 = vadd.f32 0.27886808, %v104_v37 }
 0x131   :  { %v106_v39 = vmul.f32 %v105_v38, %v93_v30 }
 0x133   :  { %v107_v40 = vadd.f32 -0.18628806, %v106_v39 }
 0x135   :  { %v108_v41 = vmul.f32 %v107_v40, %v93_v30 }
 0x137   :  { %v109_v43 = vadd.f32 0.09678418, %v108_v41 }
 0x139   :  { %v110_v45 = vmul.f32 %v109_v43, %v93_v30 }
 0x13b   :  { %v111_v46 = vadd.f32 0.37409195, %v110_v45 }
 0x13d   :  { %v112_v48 = vmul.f32 %v111_v46, %v93_v30 }
 0x13f   :  { %v113_v49 = vadd.f32 1.0000237, %v112_v48 }
 0x141   :  { %v114_v51 = vmul.f32 %v113_v49, %v93_v30 }
 0x143   :  { %v115_v52 = vadd.f32 %v215_v50, %v114_v51 }
 0x145   :  { %v116_v53 = vmul.f32 1.442695, %v115_v52 }
 0x147   :  { %227 = vpow2.f32 %v116_v53 }
 0x14d   :  { %v228_v54 = vpop.eup %227 }
 0x14e   :  { %v118_v55 = vmul.f32 %v228_v54, %v93_v30 }
 0x150   :  { %v120_v56 = vsub.f32 1.0, %v118_v55  ;;  %v216_v57 = vadd.f32 -1.0, %v118_v55 }
 0x152   :  { %v122_v58 = vsel %vm119_vm7, %v120_v56, %v216_v57 }
 0x153   :  { %v123_v60 = vadd.f32 1.0, %v122_v58 }
 0x155   :  { %v124_v61 = vmul.f32 %v123_v60, %v75_v59 }
 0x157   :  { %218 = vmatmul.msk.f32.vlgmr.msra.gmra.mxu1 %vm126_vm8, %v124_v61 }
 0x1d4   :  { %v151_v63 = vpop.f32.mrf.mxu1 }
 0x1d5   :  { %v154_v2 = vsub.f32 0.0, %v151_v63 }
 0x1d7   :  { %v155_v5 = vmul.f32 1.442695, %v154_v2 }
 0x1d9   :  { %229 = vpow2.f32 %v155_v5 }
 0x1df   :  { %v230_v6 = vpop.eup %229 }
 0x1e0   :  { %v157_v7 = vadd.f32 1.0, %v230_v6 }
 0x1e2   :  { %231 = vrcp.f32 %v157_v7  ;;  %v169_v12 = vand.u32 2147483648, %v157_v7  ;;  %v167_v14 = vand.u32 2147483647, %v157_v7  ;;  %vm163_vm10 = vweird.f32 %v157_v7 }
 0x1e4   :  { %v170_v8 = vor.u32 1.1754944e-38, %v169_v12  ;;  %vm168_vm12 = vcmp.eq.f32.partialorder %v167_v14, 8.507059e+37 }
 0x1e8   :  { %v232_v9 = vpop.eup %231 }
 0x1e9   :  { %v159_v10 = vmul.f32 %v232_v9, %v157_v7  ;;  %vm164_vm9 = vweird.f32 %v232_v9 }
 0x1ea   :  { %vm165_vm11 = vmor %vm163_vm10, %vm164_vm9 }
 0x1eb   :  { %v160_v11 = vsub.f32 1.0, %v159_v10 }
 0x1ed   :  { %v161_v13 = vmul.f32 %v232_v9, %v160_v11 }
 0x1ef   :  { %v162_v15 = vadd.f32 %v232_v9, %v161_v13 }
 0x1f1   :  { %v166_v16 = vsel %vm165_vm11, %v232_v9, %v162_v15 }
 0x1f2   :  { %v171_v17 = vsel %vm168_vm12, %v170_v8, %v166_v16 }
 0x1f3   :  { %v173_v18 = vperm.slane %v171_v17, 0  ;;  %v180_v19 = vperm.slane %v171_v17, 1 }
 0x1f5   :  { %178 = vperm.xlu1 %223, %v173_v18  }
 0x1fd   :  { %185 = vperm.xlu1 %223, %v180_v19  }
 0x267   :  { %v179_v20 = vpop.permute.xlu1 %178 }
 0x268   :  { %v187_v21 = vmul.f32 %v179_v20, %v315_v0  ;;  %v188_v22 = vmul.f32 %v179_v20, %v317_v1 }
 0x26a   :  { %191 = vst [vmem:[#allocation5] sm:$0xff] %v187_v21 }
 0x26b   :  { %192 = vst [vmem:[#allocation5 + $0x8] sm:$0xff] %v188_v22 }
 0x26f   :  { %v186_v23 = vpop.permute.xlu1 %185 }
 0x270   :  { %v189_v24 = vmul.f32 %v186_v23, %v321_v3  ;;  %v190_v25 = vmul.f32 %v186_v23, %v323_v4 }
 0x272   :  { %193 = vst [vmem:[#allocation5 + $0x10] sm:$0xff] %v189_v24 }
 0x273   :  { %194 = vst [vmem:[#allocation5 + $0x18] sm:$0xff] %v190_v25 }
 0x274   :  { %207 = dma.vmem_to_hbm [thread:$0]  %s200_s21, 512, %s202_s24, [#allocation4], %s286_s17, %s286_s17, %s287_s18  }
 0x275   :  { %283 = dma.done.wait [#allocation4], 512  }
 0x276   :  { %284 = vsyncadd [#allocation4], 4294966784 }
 0x277   :  { %212 = vsyncpa [#allocation3], 1 }
 0x278   :  { %213 = vsyncpa [#allocation4], 1 }

// kernel: tpu_custom_call.1
= control target key start
LH: loop header
LB: loop body
LE: loop exit
PB: predicated region body
PF: predicated region fallthrough
CT: control target
= control target key end

     0   :  { %8 = vsyncpa [#allocation3], 0  ;;  %s345_s0 = inlined_call_operand.hbm [shape: f32[2,8,256], index: 0, kind: input, shape index: {}]   ;;  %s346_s1 = inlined_call_operand.vmem [shape: f32[8,2], index: 1, kind: input, shape index: {}]   ;;  %s347_s2 = inlined_call_operand.vmem [shape: f32[2,8], index: 2, kind: input, shape index: {}]   ;;  %s348_s3 = inlined_call_operand.hbm [shape: f32[2,8,256], index: 3, kind: output, shape index: {}]  }
   0x1   :  { %9 = vsyncpa [#allocation4], 0  ;;  %s14_s14 = sshll.u32 %s345_s0, 4  ;;  %s285_s15 = smov [#allocation2]   ;;  %s15_s14 = int_to_ptr.hbm [resolvable:$true] %s14_s14 }
   0x2   :  { %s16_s16 = sshll.u32 %s285_s15, 4  ;;  %s286_s17 = smov 256   ;;  %s17_s16 = int_to_ptr.vmem [resolvable:$true] %s16_s16 }
   0x3   :  { %s287_s18 = smov 16  }
   0x4   :  { %22 = dma.hbm_to_vmem [thread:$0]  %s15_s14, 512, %s17_s16, [#allocation3], %s286_s17, %s286_s17, %s287_s18  }
   0x5   :  { %281 = dma.done.wait [#allocation3], 512  }
   0x6   :  { %282 = vsyncadd [#allocation3], 4294966784  ;;  %v315_v0 = vld [vmem:[#allocation2] sm:$0xff]  ;;  %v317_v1 = vld [vmem:[#allocation2 + $0x8] sm:$0xff]  ;;  %v46_v8 = vlaneseq  ;;  %vm50_vm0 = vcmask 1041409   ;;  %vm52_vm1 = vcmask 64512  }
   0x7   :  { %v35_v2 = vadd.f32 %v317_v1, %v315_v0  ;;  %v321_v3 = vld [vmem:[#allocation2 + $0x10] sm:$0xff]  ;;  %v323_v4 = vld [vmem:[#allocation2 + $0x18] sm:$0xff]  ;;  %v43_v6 = vld [vmem:[%s346_s1] sm:$0xff]  ;;  %vm130_vm6 = vcmask 1041408   ;;  %vm126_vm8 = vcmask 15360   ;;  %s201_s24 = sshll.u32 %s348_s3, 4  ;;  %s202_s24 = int_to_ptr.hbm [resolvable:$true] %s201_s24 }
   0x8   :  { %v38_v5 = vadd.f32 %v323_v4, %v321_v3  ;;  %70 = vmatpush.msra.mxu0 %v43_v6  ;;  %v47_v9 = vand.u32 127, %v46_v8  ;;  %v125_v42 = vld [vmem:[%s347_s2] sm:$0x3]  ;;  %v175_v62 = vshrl.u32 %v46_v8, 7  ;;  %s288_s2 = smov [#allocation5]  }
   0x9   :  { %36 = vadd.xlane.f32.xlu0 %v35_v2  ;;  %217 = vmatpush.msk.msra.mxu1 %vm130_vm6, %v125_v42  ;;  %s199_s21 = sshll.u32 %s288_s2, 4  ;;  %s200_s21 = int_to_ptr.vmem [resolvable:$true] %s199_s21 }
   0xa   :  { %223 = vset.pattern.permute.xlu1 %v175_v62  ;;  %224 = vset.pattern.permute.xlu0 %v175_v62 }
  0x11   :  { %39 = vadd.xlane.f32.xlu0 %v38_v5 }
  0x7c   :  { %v37_v7 = vpop.xlane.xlu0 %36 }
  0x7d   :  { %v41_v10 = vmul.f32 0.00390625, %v37_v7 }
  0x7f   :  { %v48_v13 = vperm.slane %v41_v10, %v47_v9 }
  0x84   :  { %v40_v11 = vpop.xlane.xlu0 %39 }
  0x85   :  { %v42_v12 = vmul.f32 0.00390625, %v40_v11 }
  0x87   :  { %v49_v14 = vperm.slane %v42_v12, %v47_v9 }
  0x89   :  { %v51_v15 = vsel %vm50_vm0, %v49_v14, %v48_v13 }
  0x8a   :  { %214 = vmatmul.msk.f32.vlgmr.msra.gmra.mxu0 %vm52_vm1, %v51_v15 }
 0x107   :  { %v72_v16 = vpop.f32.mrf.mxu0 }
 0x108   :  { %v76_v17 = vmul.f32 0.70710677, %v72_v16  ;;  %v75_v59 = vmul.f32 0.5, %v72_v16 }
 0x10a   :  { %v77_v18 = vand.u32 2147483647, %v76_v17  ;;  %v95_v44 = vsub.f32 0.0, %v76_v17  ;;  %vm119_vm7 = vcmp.ge.f32.partialorder %v76_v17, 0.0 }
 0x10c   :  { %v78_v19 = vmul.f32 0.5, %v77_v18  ;;  %v96_v47 = vmul.f32 %v95_v44, %v76_v17 }
 0x10e   :  { %v79_v20 = vadd.f32 1.0, %v78_v19  ;;  %v215_v50 = vadd.f32 -1.2655122, %v96_v47 }
 0x110   :  { %225 = vrcp.f32 %v79_v20  ;;  %v91_v24 = vand.u32 2147483648, %v79_v20  ;;  %v89_v26 = vand.u32 2147483647, %v79_v20  ;;  %vm85_vm3 = vweird.f32 %v79_v20 }
 0x112   :  { %v92_v28 = vor.u32 1.1754944e-38, %v91_v24  ;;  %vm90_vm5 = vcmp.eq.f32.partialorder %v89_v26, 8.507059e+37 }
 0x116   :  { %v226_v21 = vpop.eup %225 }
 0x117   :  { %v81_v22 = vmul.f32 %v226_v21, %v79_v20  ;;  %vm86_vm2 = vweird.f32 %v226_v21 }
 0x118   :  { %vm87_vm4 = vmor %vm85_vm3, %vm86_vm2 }
 0x119   :  { %v82_v23 = vsub.f32 1.0, %v81_v22 }
 0x11b   :  { %v83_v25 = vmul.f32 %v226_v21, %v82_v23 }
 0x11d   :  { %v84_v27 = vadd.f32 %v226_v21, %v83_v25 }
 0x11f   :  { %v88_v29 = vsel %vm87_vm4, %v226_v21, %v84_v27 }
 0x120   :  { %v93_v30 = vsel %vm90_vm5, %v92_v28, %v88_v29 }
 0x121   :  { %v98_v31 = vmul.f32 0.17087276, %v93_v30 }
 0x123   :  { %v99_v32 = vadd.f32 -0.82215226, %v98_v31 }
 0x125   :  { %v100_v33 = vmul.f32 %v99_v32, %v93_v30 }
 0x127   :  { %v101_v34 = vadd.f32 1.4885159, %v100_v33 }
 0x129   :  { %v102_v35 = vmul.f32 %v101_v34, %v93_v30 }
 0x12b   :  { %v103_v36 = vadd.f32 -1.135204, %v102_v35 }
 0x12d   :  { %v104_v37 = vmul.f32 %v103_v36, %v93_v30 }
 0x12f   :  { %v105_v38 = vadd.f32 0.27886808, %v104_v37 }
 0x131   :  { %v106_v39 = vmul.f32 %v105_v38, %v93_v30 }
 0x133   :  { %v107_v40 = vadd.f32 -0.18628806, %v106_v39 }
 0x135   :  { %v108_v41 = vmul.f32 %v107_v40, %v93_v30 }
 0x137   :  { %v109_v43 = vadd.f32 0.09678418, %v108_v41 }
 0x139   :  { %v110_v45 = vmul.f32 %v109_v43, %v93_v30 }
 0x13b   :  { %v111_v46 = vadd.f32 0.37409195, %v110_v45 }
 0x13d   :  { %v112_v48 = vmul.f32 %v111_v46, %v93_v30 }
 0x13f   :  { %v113_v49 = vadd.f32 1.0000237, %v112_v48 }
 0x141   :  { %v114_v51 = vmul.f32 %v113_v49, %v93_v30 }
 0x143   :  { %v115_v52 = vadd.f32 %v215_v50, %v114_v51 }
 0x145   :  { %v116_v53 = vmul.f32 1.442695, %v115_v52 }
 0x147   :  { %227 = vpow2.f32 %v116_v53 }
 0x14d   :  { %v228_v54 = vpop.eup %227 }
 0x14e   :  { %v118_v55 = vmul.f32 %v228_v54, %v93_v30 }
 0x150   :  { %v120_v56 = vsub.f32 1.0, %v118_v55  ;;  %v216_v57 = vadd.f32 -1.0, %v118_v55 }
 0x152   :  { %v122_v58 = vsel %vm119_vm7, %v120_v56, %v216_v57 }
 0x153   :  { %v123_v60 = vadd.f32 1.0, %v122_v58 }
 0x155   :  { %v124_v61 = vmul.f32 %v123_v60, %v75_v59 }
 0x157   :  { %218 = vmatmul.msk.f32.vlgmr.msra.gmra.mxu1 %vm126_vm8, %v124_v61 }
 0x1d4   :  { %v151_v63 = vpop.f32.mrf.mxu1 }
 0x1d5   :  { %v154_v2 = vsub.f32 0.0, %v151_v63 }
 0x1d7   :  { %v155_v5 = vmul.f32 1.442695, %v154_v2 }
 0x1d9   :  { %229 = vpow2.f32 %v155_v5 }
 0x1df   :  { %v230_v6 = vpop.eup %229 }
 0x1e0   :  { %v157_v7 = vadd.f32 1.0, %v230_v6 }
 0x1e2   :  { %231 = vrcp.f32 %v157_v7  ;;  %v169_v12 = vand.u32 2147483648, %v157_v7  ;;  %v167_v14 = vand.u32 2147483647, %v157_v7  ;;  %vm163_vm10 = vweird.f32 %v157_v7 }
 0x1e4   :  { %v170_v8 = vor.u32 1.1754944e-38, %v169_v12  ;;  %vm168_vm12 = vcmp.eq.f32.partialorder %v167_v14, 8.507059e+37 }
 0x1e8   :  { %v232_v9 = vpop.eup %231 }
 0x1e9   :  { %v159_v10 = vmul.f32 %v232_v9, %v157_v7  ;;  %vm164_vm9 = vweird.f32 %v232_v9 }
 0x1ea   :  { %vm165_vm11 = vmor %vm163_vm10, %vm164_vm9 }
 0x1eb   :  { %v160_v11 = vsub.f32 1.0, %v159_v10 }
 0x1ed   :  { %v161_v13 = vmul.f32 %v232_v9, %v160_v11 }
 0x1ef   :  { %v162_v15 = vadd.f32 %v232_v9, %v161_v13 }
 0x1f1   :  { %v166_v16 = vsel %vm165_vm11, %v232_v9, %v162_v15 }
 0x1f2   :  { %v171_v17 = vsel %vm168_vm12, %v170_v8, %v166_v16 }
 0x1f3   :  { %v173_v18 = vperm.slane %v171_v17, 0  ;;  %v180_v19 = vperm.slane %v171_v17, 1 }
 0x1f5   :  { %178 = vperm.xlu1 %223, %v173_v18  }
 0x1fd   :  { %185 = vperm.xlu1 %223, %v180_v19  }
 0x267   :  { %v179_v20 = vpop.permute.xlu1 %178 }
 0x268   :  { %v187_v21 = vmul.f32 %v179_v20, %v315_v0  ;;  %v188_v22 = vmul.f32 %v179_v20, %v317_v1 }
 0x26a   :  { %191 = vst [vmem:[#allocation5] sm:$0xff] %v187_v21 }
 0x26b   :  { %192 = vst [vmem:[#allocation5 + $0x8] sm:$0xff] %v188_v22 }
 0x26f   :  { %v186_v23 = vpop.permute.xlu1 %185 }
 0x270   :  { %v189_v24 = vmul.f32 %v186_v23, %v321_v3  ;;  %v190_v25 = vmul.f32 %v186_v23, %v323_v4 }
 0x272   :  { %193 = vst [vmem:[#allocation5 + $0x10] sm:$0xff] %v189_v24 }
 0x273   :  { %194 = vst [vmem:[#allocation5 + $0x18] sm:$0xff] %v190_v25 }
 0x274   :  { %207 = dma.vmem_to_hbm [thread:$0]  %s200_s21, 512, %s202_s24, [#allocation4], %s286_s17, %s286_s17, %s287_s18  }
 0x275   :  { %283 = dma.done.wait [#allocation4], 512  }
 0x276   :  { %284 = vsyncadd [#allocation4], 4294966784 }
 0x277   :  { %212 = vsyncpa [#allocation3], 1 }
 0x278   :  { %213 = vsyncpa [#allocation4], 1 }

</bundles_post_ra>
